<compile_context>
chip_gen: v7x
topology: tpu7x:2x2x1
jax: 0.10.0
libtpu: 0.0.40
codegen_flags: <defaults>
</compile_context>

<pallas_src>
import jax
import jax.numpy as jnp
from jax.experimental import pallas as pl
from jax.experimental.pallas import tpu as pltpu


def _round_up(x, m):
    return ((x + m - 1) // m) * m


# ------------------------------------------------------------------ kernel ---
def mlp_policy_kernel(x_ref, norm_ref, w_ref, b_ref, out_ref):
    ni = x_ref.shape[1]          # padded num_inputs (static, multiple of 16)
    cdt = w_ref.dtype            # MXU operand dtype (bf16 by default)

    # ObsNorm: (x - mean) * inv_std, clipped to [-5, 5].
    xn = jnp.clip((x_ref[...] - norm_ref[0:1, :]) * norm_ref[1:2, :], -5.0, 5.0)

    # Packed weight slab (static, sublane-aligned slices of one VMEM block).
    w1 = w_ref[0:ni, :]               # [ni, 128]   = [Wv1 | Wa1]
    w2 = w_ref[ni:ni + 128, :]        # [128, 128]  block-diag(Wv2, Wa2)
    w3 = w_ref[ni + 128:ni + 256, :]  # [128, 128]  value head col 0 + actor identity

    # Layer 1 (fused critic+actor): lanes 0:64 critic, 64:128 actor.
    h1 = jnp.tanh(
        jnp.dot(xn.astype(cdt), w1, preferred_element_type=jnp.float32)
        + b_ref[0:1, :])
    # Layer 2 (block-diagonal, still fused).
    h2 = jnp.tanh(
        jnp.dot(h1.astype(cdt), w2, preferred_element_type=jnp.float32)
        + b_ref[1:2, :])
    # Layer 3: value head in lane 0, actor hidden passed through in 64:128.
    out = (jnp.dot(h2.astype(cdt), w3, preferred_element_type=jnp.float32)
           + b_ref[2:3, :])
    out_ref[...] = out.astype(out_ref.dtype)


# ----------------------------------------------------------------- wrapper ---
def mlp_policy_forward(x, packed, *, tile_b=1024, out_dtype=jnp.float32):
    """x: [B, num_inputs] float32. Returns (value [B,1], actor_hidden [B,64])."""
    B, num_inputs = x.shape
    ni_pad = packed["w"].shape[0] - 256

    x = x.astype(jnp.float32)
    # Column-pad only if num_inputs was rounded up; no batch-dim pad copy.
    if num_inputs != ni_pad:
        x = jax.lax.pad(x, jnp.float32(0.0),
                        ((0, 0, 0), (0, ni_pad - num_inputs, 0)))

    # Batch tile: multiple of 8, <= 2048 (fits v5e's 16 MiB scoped VMEM with
    # double-buffered I/O + intermediates), and small enough that the grid has
    # >= 2 steps whenever B allows, so v7x's two TensorCores both get work.
    tb = min(int(tile_b), 2048, max(8, _round_up(pl.cdiv(B, 2), 8)))
    grid_b = pl.cdiv(B, tb)
    rows = grid_b * tb

    cost = pl.CostEstimate(
        flops=2 * rows * (ni_pad * 128 + 128 * 128 + 128 * 128),
        transcendentals=2 * rows * 128,
        bytes_accessed=int(
            x.size * x.dtype.itemsize
            + packed["norm"].size * 4
            + packed["w"].size * packed["w"].dtype.itemsize
            + packed["b"].size * 4
            + B * 128 * jnp.dtype(out_dtype).itemsize),
    )

    out = pl.pallas_call(
        mlp_policy_kernel,
        out_shape=jax.ShapeDtypeStruct((B, 128), out_dtype),
        grid_spec=pltpu.PrefetchScalarGridSpec(
            num_scalar_prefetch=0,
            grid=(grid_b,),
            in_specs=[
                pl.BlockSpec((tb, ni_pad), lambda i: (i, 0)),          # x tile
                pl.BlockSpec((2, ni_pad), lambda i: (0, 0)),           # norm stats
                pl.BlockSpec((ni_pad + 256, 128), lambda i: (0, 0)),   # weight slab
                pl.BlockSpec((3, 128), lambda i: (0, 0)),              # bias slab
            ],
            out_specs=pl.BlockSpec((tb, 128), lambda i: (i, 0)),
        ),
        compiler_params=pltpu.CompilerParams(
            dimension_semantics=("parallel",)),
        cost_estimate=cost,
    )(x, packed["norm"], packed["w"], packed["b"])

    value = out[:, 0:1].astype(jnp.float32)
    actor = out[:, 64:128].astype(jnp.float32)
    return value, actor


# -------------------------------------------------------------- param init ---
def _init_linear(key, out_features, in_features):
    """weights_init_mlp: N(0,1) rows, each row L2-normalized; returns W^T."""
    w = jax.random.normal(key, (out_features, in_features), dtype=jnp.float32)
    w = w / jnp.sqrt(jnp.sum(w * w, axis=1, keepdims=True))
    return w.T  # stored as [in, out] so forward does x @ W


def make_params(key, num_inputs):
    """Raw (unfused) parameters matching the PyTorch module layout."""
    keys = jax.random.split(key, 5)
    return {
        # ObsNorm running stats at init: mean 0, std 1.
        "obs_mean": jnp.zeros((1, num_inputs), jnp.float32),
        "obs_std": jnp.ones((1, num_inputs), jnp.float32),
        # critic
        "wv1": _init_linear(keys[0], 64, num_inputs),
        "bv1": jnp.zeros((1, 64), jnp.float32),
        "wv2": _init_linear(keys[1], 64, 64),
        "bv2": jnp.zeros((1, 64), jnp.float32),
        "wv3": _init_linear(keys[2], 1, 64),
        "bv3": jnp.zeros((1, 1), jnp.float32),
        # actor
        "wa1": _init_linear(keys[3], 64, num_inputs),
        "ba1": jnp.zeros((1, 64), jnp.float32),
        "wa2": _init_linear(keys[4], 64, 64),
        "ba2": jnp.zeros((1, 64), jnp.float32),
    }


def pack_params(p, compute_dtype=jnp.bfloat16):
    """Pack raw params into the 3 fused kernel arrays (done once, offline)."""
    num_inputs = p["wv1"].shape[0]
    ni_pad = _round_up(num_inputs, 16)   # 16 keeps bf16 sublane-packed slices aligned

    # ObsNorm stats: row 0 = mean, row 1 = 1/(std+eps) (precomputed, f32).
    mean = jnp.zeros((1, ni_pad), jnp.float32).at[:, :num_inputs].set(p["obs_mean"])
    inv_std = jnp.ones((1, ni_pad), jnp.float32).at[:, :num_inputs].set(
        1.0 / (p["obs_std"] + 1e-8))
    norm = jnp.concatenate([mean, inv_std], axis=0)            # [2, ni_pad]

    # Layer 1: [ni_pad, 128] = [Wv1 | Wa1] (zero rows for padded inputs).
    w1 = jnp.zeros((ni_pad, 128), jnp.float32)
    w1 = w1.at[:num_inputs, :64].set(p["wv1"]).at[:num_inputs, 64:].set(p["wa1"])
    # Layer 2: block-diagonal [128, 128].
    w2 = jnp.zeros((128, 128), jnp.float32)
    w2 = w2.at[:64, :64].set(p["wv2"]).at[64:, 64:].set(p["wa2"])
    # Layer 3: value head in column 0, actor identity pass-through in 64:128.
    w3 = jnp.zeros((128, 128), jnp.float32)
    w3 = w3.at[:64, 0:1].set(p["wv3"]).at[64:, 64:].set(jnp.eye(64, dtype=jnp.float32))
    w_slab = jnp.concatenate([w1, w2, w3], axis=0).astype(compute_dtype)

    b1 = jnp.concatenate([p["bv1"], p["ba1"]], axis=1)          # [1, 128]
    b2 = jnp.concatenate([p["bv2"], p["ba2"]], axis=1)          # [1, 128]
    b3 = jnp.zeros((1, 128), jnp.float32).at[:, 0:1].set(p["bv3"])
    b_slab = jnp.concatenate([b1, b2, b3], axis=0)               # [3, 128], f32

    return {"norm": norm, "w": w_slab, "b": b_slab}


# --------------------------------------------------------------- reference ---
def reference_forward(x, p, compute_dtype=jnp.float32):
    """Plain-JAX, unfused forward matching the PyTorch module semantics.

    compute_dtype=bfloat16 mirrors the kernel's MXU operand dtype (bf16
    operands, f32 accumulation, actor output routed through the bf16
    identity pass-through)."""
    def mm(a, w):
        return jnp.dot(a.astype(compute_dtype), w.astype(compute_dtype),
                       preferred_element_type=jnp.float32)

    xn = jnp.clip((x - p["obs_mean"]) / (p["obs_std"] + 1e-8), -5.0, 5.0)
    v = jnp.tanh(mm(xn, p["wv1"]) + p["bv1"])
    v = jnp.tanh(mm(v, p["wv2"]) + p["bv2"])
    value = mm(v, p["wv3"]) + p["bv3"]
    a = jnp.tanh(mm(xn, p["wa1"]) + p["ba1"])
    a = jnp.tanh(mm(a, p["wa2"]) + p["ba2"])
    if jnp.dtype(compute_dtype) != jnp.dtype(jnp.float32):
        a = a.astype(compute_dtype).astype(jnp.float32)
    return value, a


if __name__ == "__main__":
    key = jax.random.PRNGKey(0)
    k_param, k_x = jax.random.split(key)

    num_inputs = 16
    batch = 8

    params = make_params(k_param, num_inputs)
    packed = pack_params(params)  # bf16 weight slab, f32 norm/bias
    x = jax.random.normal(k_x, (batch, num_inputs), dtype=jnp.float32)

    value, actor_x = mlp_policy_forward(x, packed)
    jax.block_until_ready((value, actor_x))
    assert value.shape == (batch, 1) and actor_x.shape == (batch, 64)

    # 1) vs. a reference that mirrors the kernel's bf16 MXU operand dtype.
    v_m, a_m = reference_forward(x, params, compute_dtype=jnp.bfloat16)
    assert jnp.allclose(value, v_m, atol=5e-3, rtol=5e-3), "bf16-matched value mismatch"
    assert jnp.allclose(actor_x, a_m, atol=5e-3, rtol=5e-3), "bf16-matched actor mismatch"

    # 2) vs. the faithful f32 (PyTorch-equivalent) reference: only bf16-MXU
    #    operand rounding separates them for this 64-wide tanh policy net.
    v_f, a_f = reference_forward(x, params, compute_dtype=jnp.float32)
    assert jnp.allclose(value, v_f, atol=3e-2, rtol=3e-2), "f32 reference value mismatch"
    assert jnp.allclose(actor_x, a_f, atol=3e-2, rtol=3e-2), "f32 reference actor mismatch"

    print("KERNEL_OK")
</pallas_src>

<mosaic_0001>
module attributes {stable_mosaic.version = 11 : i64} {
  func.func @mlp_policy_kernel(%arg0: i32, %arg1: memref<8x16xf32, #tpu.memory_space<vmem>>, %arg2: memref<2x16xf32, #tpu.memory_space<vmem>>, %arg3: memref<272x128xbf16, #tpu.memory_space<vmem>>, %arg4: memref<3x128xf32, #tpu.memory_space<vmem>>, %arg5: memref<8x128xf32, #tpu.memory_space<vmem>>) attributes {dimension_semantics = [#tpu.dimension_semantics<parallel>], iteration_bounds = array<i64: 1>, scalar_prefetch = 0 : i64, scratch_operands = 0 : i64, tpu.core_type = #tpu.core_type<tc>, window_params = [{transform_indices = @transform_0, window_bounds = array<i64: 8, 16>}, {pipeline_mode = #tpu.pipeline_mode<synchronous>, transform_indices = @transform_1, window_bounds = array<i64: 2, 16>}, {pipeline_mode = #tpu.pipeline_mode<synchronous>, transform_indices = @transform_2, window_bounds = array<i64: 272, 128>}, {pipeline_mode = #tpu.pipeline_mode<synchronous>, transform_indices = @transform_3, window_bounds = array<i64: 3, 128>}, {transform_indices = @transform_4, window_bounds = array<i64: 8, 128>}]} {
    %c0 = arith.constant 0 : index
    %c0_0 = arith.constant 0 : index
    %0 = vector.load %arg1[%c0, %c0_0] : memref<8x16xf32, #tpu.memory_space<vmem>>, vector<8x16xf32>
    %c0_1 = arith.constant 0 : index
    %c0_2 = arith.constant 0 : index
    %1 = vector.load %arg2[%c0_1, %c0_2] : memref<2x16xf32, #tpu.memory_space<vmem>>, vector<1x16xf32>
    %2 = vector.broadcast %1 : vector<1x16xf32> to vector<8x16xf32>
    %3 = arith.subf %0, %2 : vector<8x16xf32>
    %c1 = arith.constant 1 : index
    %c0_3 = arith.constant 0 : index
    %4 = vector.load %arg2[%c1, %c0_3] : memref<2x16xf32, #tpu.memory_space<vmem>>, vector<1x16xf32>
    %5 = vector.broadcast %4 : vector<1x16xf32> to vector<8x16xf32>
    %6 = arith.mulf %3, %5 : vector<8x16xf32>
    %cst = arith.constant -5.000000e+00 : f32
    %cst_4 = arith.constant 5.000000e+00 : f32
    %7 = vector.broadcast %cst : f32 to vector<8x16xf32>
    %8 = arith.maximumf %7, %6 : vector<8x16xf32>
    %9 = vector.broadcast %cst_4 : f32 to vector<8x16xf32>
    %10 = arith.minimumf %9, %8 : vector<8x16xf32>
    %c0_5 = arith.constant 0 : index
    %c0_6 = arith.constant 0 : index
    %11 = vector.load %arg3[%c0_5, %c0_6] : memref<272x128xbf16, #tpu.memory_space<vmem>>, vector<16x128xbf16>
    %c16 = arith.constant 16 : index
    %c0_7 = arith.constant 0 : index
    %12 = vector.load %arg3[%c16, %c0_7] : memref<272x128xbf16, #tpu.memory_space<vmem>>, vector<128x128xbf16>
    %c144 = arith.constant 144 : index
    %c0_8 = arith.constant 0 : index
    %13 = vector.load %arg3[%c144, %c0_8] : memref<272x128xbf16, #tpu.memory_space<vmem>>, vector<128x128xbf16>
    %14 = arith.truncf %10 : vector<8x16xf32> to vector<8x16xbf16>
    %cst_9 = arith.constant dense<0.000000e+00> : vector<8x128xf32>
    %15 = tpu.matmul %14, %11, %cst_9 {dimension_numbers = #tpu.dot_dimension_numbers<[1], [0], [0], [1], [0, 0, 1, 1], [], []>} : vector<8x16xbf16>, vector<16x128xbf16>, vector<8x128xf32> -> vector<8x128xf32>
    %c0_10 = arith.constant 0 : index
    %c0_11 = arith.constant 0 : index
    %16 = vector.load %arg4[%c0_10, %c0_11] : memref<3x128xf32, #tpu.memory_space<vmem>>, vector<1x128xf32>
    %17 = vector.broadcast %16 : vector<1x128xf32> to vector<8x128xf32>
    %18 = arith.addf %15, %17 : vector<8x128xf32>
    %19 = math.tanh %18 : vector<8x128xf32>
    %20 = arith.truncf %19 : vector<8x128xf32> to vector<8x128xbf16>
    %cst_12 = arith.constant dense<0.000000e+00> : vector<8x128xf32>
    %21 = tpu.matmul %20, %12, %cst_12 {dimension_numbers = #tpu.dot_dimension_numbers<[1], [0], [0], [1], [0, 0, 1, 1], [], []>} : vector<8x128xbf16>, vector<128x128xbf16>, vector<8x128xf32> -> vector<8x128xf32>
    %c1_13 = arith.constant 1 : index
    %c0_14 = arith.constant 0 : index
    %22 = vector.load %arg4[%c1_13, %c0_14] : memref<3x128xf32, #tpu.memory_space<vmem>>, vector<1x128xf32>
    %23 = vector.broadcast %22 : vector<1x128xf32> to vector<8x128xf32>
    %24 = arith.addf %21, %23 : vector<8x128xf32>
    %25 = math.tanh %24 : vector<8x128xf32>
    %26 = arith.truncf %25 : vector<8x128xf32> to vector<8x128xbf16>
    %cst_15 = arith.constant dense<0.000000e+00> : vector<8x128xf32>
    %27 = tpu.matmul %26, %13, %cst_15 {dimension_numbers = #tpu.dot_dimension_numbers<[1], [0], [0], [1], [0, 0, 1, 1], [], []>} : vector<8x128xbf16>, vector<128x128xbf16>, vector<8x128xf32> -> vector<8x128xf32>
    %c2 = arith.constant 2 : index
    %c0_16 = arith.constant 0 : index
    %28 = vector.load %arg4[%c2, %c0_16] : memref<3x128xf32, #tpu.memory_space<vmem>>, vector<1x128xf32>
    %29 = vector.broadcast %28 : vector<1x128xf32> to vector<8x128xf32>
    %30 = arith.addf %27, %29 : vector<8x128xf32>
    %c0_17 = arith.constant 0 : index
    %c0_18 = arith.constant 0 : index
    %31 = vector.load %arg5[%c0_17, %c0_18] : memref<8x128xf32, #tpu.memory_space<vmem>>, vector<8x128xf32>
    tpu.vector_store %arg5[%c0_17, %c0_18], %30 {strides = array<i32>} : memref<8x128xf32, #tpu.memory_space<vmem>>, vector<8x128xf32>,
    return
  }
  func.func @transform_0(%arg0: i32) -> (i32, i32) {
    %c0_i32 = arith.constant 0 : i32
    %c0_i32_0 = arith.constant 0 : i32
    return %arg0, %c0_i32 : i32, i32
  }
  func.func @transform_1(%arg0: i32) -> (i32, i32) {
    %c0_i32 = arith.constant 0 : i32
    %c0_i32_0 = arith.constant 0 : i32
    %c0_i32_1 = arith.constant 0 : i32
    return %c0_i32, %c0_i32_0 : i32, i32
  }
  func.func @transform_2(%arg0: i32) -> (i32, i32) {
    %c0_i32 = arith.constant 0 : i32
    %c0_i32_0 = arith.constant 0 : i32
    %c0_i32_1 = arith.constant 0 : i32
    return %c0_i32, %c0_i32_0 : i32, i32
  }
  func.func @transform_3(%arg0: i32) -> (i32, i32) {
    %c0_i32 = arith.constant 0 : i32
    %c0_i32_0 = arith.constant 0 : i32
    %c0_i32_1 = arith.constant 0 : i32
    return %c0_i32, %c0_i32_0 : i32, i32
  }
  func.func @transform_4(%arg0: i32) -> (i32, i32) {
    %c0_i32 = arith.constant 0 : i32
    %c0_i32_0 = arith.constant 0 : i32
    return %arg0, %c0_i32 : i32, i32
  }
}

</mosaic_0001>

<bundles_post_ra>
// kernel: tpu_custom_call.1
= control target key start
LH: loop header
LB: loop body
LE: loop exit
PB: predicated region body
PF: predicated region fallthrough
CT: control target
= control target key end

     0   :  { %9 = vsyncpa [#allocation3], 0  ;;  %s660_s0 = inlined_call_operand.hbm [shape: f32[8,16], index: 0, kind: input, shape index: {}]   ;;  %s661_s1 = inlined_call_operand.vmem [shape: f32[2,16], index: 1, kind: input, shape index: {}]   ;;  %s662_s2 = inlined_call_operand.hbm [shape: bf16[272,128], index: 2, kind: input, shape index: {}]   ;;  %s663_s3 = inlined_call_operand.vmem [shape: f32[3,128], index: 3, kind: input, shape index: {}]   ;;  %s664_s4 = inlined_call_operand.hbm [shape: f32[8,128], index: 4, kind: output, shape index: {}]  }
   0x1   :  { %10 = vsyncpa [#allocation6], 0 }
   0x2   :  { %11 = vsyncpa [#allocation4], 0  ;;  %s547_s15 = smov [#allocation2]   ;;  %s548_s17 = smov [#allocation5]  }
   0x3   :  { %s18_s16 = sshll.u32 %s547_s15, 4  ;;  %s29_s18 = sshll.u32 %s548_s17, 4  ;;  %s19_s16 = int_to_ptr.vmem [resolvable:$true] %s18_s16  ;;  %s579_s18 = int_to_ptr.vmem [resolvable:$true] %s29_s18 }
   0x4   :  { %s475_s21 = scalar_lea.hbm %s660_s0, 128 }
   0x5   :  { %p476_p0 = scmp.ne.s32.totalorder %s660_s0, %s475_s21  ;;  %p479_p1 = scmp.lt.u32.totalorder %s475_s21, %s660_s0 }
   0x7   :  { %p481_p2 = pnand %p479_p1, %p476_p0 }
   0x9   :  { %484 = shalt.err (!%p481_p2)
}
   0xa   :  { %s485_s26 = scalar_lea.vmem %s19_s16, 128  ;;  %p490_p4 = scmp.lt.s32.totalorder %s19_s16, %s19_s16 }
   0xb   :  { %p486_p3 = scmp.ne.s32.totalorder %s19_s16, %s485_s26  ;;  %p491_p5 = scmp.lt.s32.totalorder %s485_s26, %s485_s26 }
   0xd   :  { %p492_p6 = por %p491_p5, %p490_p4 }
   0xf   :  { %p493_p7 = pnand %p492_p6, %p486_p3 }
  0x11   :  { %496 = shalt.err (!%p493_p7)
}
  0x12   :  { %21 = dma.hbm_to_vmem [thread:$0]  %s660_s0, 128, %s19_s16, [#allocation3]  }
  0x13   :  { %s497_s5 = scalar_lea.hbm %s662_s2, 2176 }
  0x14   :  { %p498_p8 = scmp.ne.s32.totalorder %s662_s2, %s497_s5  ;;  %p501_p9 = scmp.lt.u32.totalorder %s497_s5, %s662_s2 }
  0x16   :  { %p503_p10 = pnand %p501_p9, %p498_p8 }
  0x18   :  { %506 = shalt.err (!%p503_p10)
}
  0x19   :  { %s507_s10 = scalar_lea.vmem %s579_s18, 2176  ;;  %p512_p12 = scmp.lt.s32.totalorder %s579_s18, %s579_s18 }
  0x1a   :  { %p508_p11 = scmp.ne.s32.totalorder %s579_s18, %s507_s10  ;;  %p513_p13 = scmp.lt.s32.totalorder %s507_s10, %s507_s10 }
  0x1c   :  { %p514_p0 = por %p513_p13, %p512_p12 }
  0x1e   :  { %p515_p1 = pnand %p514_p0, %p508_p11 }
  0x20   :  { %518 = shalt.err (!%p515_p1)
}
  0x21   :  { %s549_s0 = smov 64   ;;  %s550_s11 = smov 4  }
  0x22   :  { %35 = dma.hbm_to_vmem [thread:$0]  %s662_s2, 2176, %s579_s18, [#allocation6], %s549_s0, %s549_s0, %s550_s11  }
  0x23   :  { %541 = dma.done.wait [#allocation3], 128  }
  0x24   :  { %542 = vsyncadd [#allocation3], 4294967168 }
  0x25   :  { %543 = dma.done.wait [#allocation6], 2176  }
  0x26   :  { %544 = vsyncadd [#allocation6], 4294965120  ;;  %v551_v0 = vmov 0.0   ;;  %vm552_vm0 = vmmov 0   ;;  %v454_v1 = vld [vmem:[#allocation5] sm:$0xff]   ;;  %v45_v2 = vld [vmem:[#allocation2] sm:$0xff] }
  0x27   :  { %401 = vmatprep.subr.bf16.mxu0 %v551_v0  ;;  %403 = vmatprep.mubr.msk.bf16.mxu0 %vm552_vm0, %v551_v0  ;;  %v357_v3 = vld [vmem:[%s661_s1] ss:$0 sm:$0xff]  ;;  %v358_v4 = vld [vmem:[%s661_s1 + $0x1] ss:$0 sm:$0xff]  ;;  %v455_v6 = vld [vmem:[#allocation5 + $0x8] sm:$0xff]   ;;  %vm106_vm1 = vcmask 130048  }
  0x28   :  { %407 = vmatprep.subr.bf16.mxu1 %v551_v0  ;;  %423 = vmatprep.mubr.msk.bf16.mxu1 %vm552_vm0, %v551_v0  ;;  %v51_v5 = vsub.f32 %v45_v2, %v357_v3  ;;  %v456_v8 = vld [vmem:[#allocation5 + $0x10] sm:$0xff]   ;;  %v457_v10 = vld [vmem:[#allocation5 + $0x18] sm:$0xff]   ;;  %v458_v12 = vld [vmem:[#allocation5 + $0x20] sm:$0xff]   ;;  %s553_s22 = smov [#allocation7]  }
  0x29   :  { %402 = vmatpush3.bf16.msra.mxu0 %v454_v1  ;;  %408 = vmatpush3.bf16.msra.mxu1 %v455_v6  ;;  %v459_v13 = vld [vmem:[#allocation5 + $0x28] sm:$0xff]   ;;  %v460_v14 = vld [vmem:[#allocation5 + $0x30] sm:$0xff]   ;;  %v461_v15 = vld [vmem:[#allocation5 + $0x38] sm:$0xff]   ;;  %s347_s23 = sshll.u32 %s553_s22, 4  ;;  %s348_s23 = int_to_ptr.vmem [resolvable:$true] %s347_s23 }
  0x2a   :  { %427 = vmatprep.subr.bf16.mxu0 %v551_v0  ;;  %v57_v7 = vmul.f32 %v358_v4, %v51_v5  ;;  %409 = vmatprep.subr.bf16.mxu1 %v551_v0  ;;  %v462_v16 = vld [vmem:[#allocation5 + $0x40] sm:$0xff]   ;;  %v463_v17 = vld [vmem:[#allocation5 + $0x48] sm:$0xff]   ;;  %v464_v18 = vld [vmem:[#allocation5 + $0x50] sm:$0xff]   ;;  %s519_s24 = scalar_lea.vmem %s348_s23, 128  ;;  %p524_p3 = scmp.lt.s32.totalorder %s348_s23, %s348_s23 }
  0x2b   :  { %v465_v19 = vld [vmem:[#allocation5 + $0x58] sm:$0xff]   ;;  %v466_v20 = vld [vmem:[#allocation5 + $0x60] sm:$0xff]   ;;  %v467_v29 = vld [vmem:[#allocation5 + $0x68] sm:$0xff]   ;;  %p520_p2 = scmp.ne.s32.totalorder %s348_s23, %s519_s24  ;;  %p525_p4 = scmp.lt.s32.totalorder %s519_s24, %s519_s24 }
  0x2c   :  { %v359_v9 = vclamps-f32 %v57_v7, 5.0  ;;  %v360_v21 = vld [vmem:[%s663_s3] ss:$0 sm:$0xff]  ;;  %v468_v30 = vld [vmem:[#allocation5 + $0x70] sm:$0xff]   ;;  %v470_v32 = vld [vmem:[#allocation5 + $0x80] sm:$0xff]  }
  0x2d   :  { %410 = vmatpush3.bf16.msra.mxu1 %v456_v8  ;;  %v469_v31 = vld [vmem:[#allocation5 + $0x78] sm:$0xff]   ;;  %p526_p5 = por %p525_p4, %p524_p3 }
  0x2e   :  { %v94_v11 = vpack.c.bf16 %v359_v9, %v359_v9  ;;  %411 = vmatprep.subr.bf16.mxu1 %v551_v0  ;;  %v363_v33 = vld [vmem:[%s663_s3 + $0x1] ss:$0 sm:$0xff]  ;;  %v372_v41 = vld [vmem:[%s663_s3 + $0x2] ss:$0 sm:$0xff] }
  0x2f   :  { %p527_p6 = pnand %p526_p5, %p520_p2 }
  0x30   :  { %404 = vmatmul.mubr.msk.bf16.vlgmr.msra.gmra.mrb[0].mxu0 %vm106_vm1, %v94_v11 }
  0x31   :  { %443 = vmatprep.mubr.msk.bf16.mxu0 %vm552_vm0, %v551_v0  ;;  %412 = vmatpush3.bf16.msra.mxu1 %v457_v10 }
  0x32   :  { %413 = vmatprep.subr.bf16.mxu1 %v551_v0  ;;  %428 = vmatpush3.bf16.msra.mxu0 %v463_v17 }
  0x33   :  { %429 = vmatprep.subr.bf16.mxu0 %v551_v0 }
  0x35   :  { %414 = vmatpush3.bf16.msra.mxu1 %v458_v12 }
  0x36   :  { %415 = vmatprep.subr.bf16.mxu1 %v551_v0  ;;  %430 = vmatpush3.bf16.msra.mxu0 %v464_v18 }
  0x37   :  { %431 = vmatprep.subr.bf16.mxu0 %v551_v0 }
  0x39   :  { %416 = vmatpush3.bf16.msra.mxu1 %v459_v13 }
  0x3a   :  { %417 = vmatprep.subr.bf16.mxu1 %v551_v0  ;;  %432 = vmatpush3.bf16.msra.mxu0 %v465_v19 }
  0x3b   :  { %433 = vmatprep.subr.bf16.mxu0 %v551_v0 }
  0x3d   :  { %418 = vmatpush3.bf16.msra.mxu1 %v460_v14 }
  0x3e   :  { %419 = vmatprep.subr.bf16.mxu1 %v551_v0  ;;  %434 = vmatpush3.bf16.msra.mxu0 %v466_v20 }
  0x3f   :  { %435 = vmatprep.subr.bf16.mxu0 %v551_v0 }
  0x41   :  { %420 = vmatpush3.bf16.msra.mxu1 %v461_v15 }
  0x42   :  { %421 = vmatprep.subr.bf16.mxu1 %v551_v0  ;;  %436 = vmatpush3.bf16.msra.mxu0 %v467_v29 }
  0x43   :  { %437 = vmatprep.subr.bf16.mxu0 %v551_v0 }
  0x45   :  { %422 = vmatpush3.bf16.msra.mxu1 %v462_v16 }
  0x46   :  { %438 = vmatpush3.bf16.msra.mxu0 %v468_v30 }
  0x47   :  { %439 = vmatprep.subr.bf16.mxu0 %v551_v0 }
  0x4a   :  { %440 = vmatpush3.bf16.msra.mxu0 %v469_v31 }
  0x4b   :  { %441 = vmatprep.subr.bf16.mxu0 %v551_v0 }
  0x4e   :  { %442 = vmatpush3.bf16.msra.mxu0 %v470_v32 }
 0x103   :  { %v144_v22 = vpop.f32.mrb[0].mxu0 }
 0x104   :  { %v145_v23 = vadd.f32 %v360_v21, %v144_v22  ;;  %v405_v24 = vpop.f32.mrb[1].mxu0 }
 0x105   :  { %v147_v25 = vpop.f32.mrb[2].mxu0 }
 0x106   :  { %471 = vtanh.f32 %v145_v23  ;;  %v406_v26 = vpop.f32.mrb[3].mxu0 }
 0x110   :  { %v472_v27 = vpop.eup %471 }
 0x111   :  { %v151_v28 = vpack.c.bf16 %v472_v27, %v472_v27 }
 0x113   :  { %424 = vmatmul.mubr.bf16.vlgmr.msra.gmra.mrb[0].mxu1 %v151_v28 }
 0x1e6   :  { %v239_v34 = vpop.f32.mrb[0].mxu1 }
 0x1e7   :  { %v240_v35 = vadd.f32 %v363_v33, %v239_v34  ;;  %v425_v36 = vpop.f32.mrb[1].mxu1 }
 0x1e8   :  { %v242_v37 = vpop.f32.mrb[2].mxu1 }
 0x1e9   :  { %473 = vtanh.f32 %v240_v35  ;;  %v426_v38 = vpop.f32.mrb[3].mxu1 }
 0x1f3   :  { %v474_v39 = vpop.eup %473 }
 0x1f4   :  { %v246_v40 = vpack.c.bf16 %v474_v39, %v474_v39 }
 0x1f6   :  { %444 = vmatmul.mubr.bf16.vlgmr.msra.gmra.mrb[4].mxu0 %v246_v40 }
 0x2c9   :  { %v334_v42 = vpop.f32.mrb[4].mxu0 }
 0x2ca   :  { %v335_v43 = vadd.f32 %v372_v41, %v334_v42  ;;  %v445_v44 = vpop.f32.mrb[5].mxu0 }
 0x2cb   :  { %v337_v45 = vpop.f32.mrb[6].mxu0 }
 0x2cc   :  { %340 = vst [vmem:[#allocation7] sm:$0xff] %v335_v43  ;;  %v446_v46 = vpop.f32.mrb[7].mxu0 }
 0x2cd   :  { %530 = shalt.err (!%p527_p6)
}
 0x2ce   :  { %s531_s3 = scalar_lea.hbm %s664_s4, 128 }
 0x2cf   :  { %p532_p7 = scmp.ne.s32.totalorder %s664_s4, %s531_s3  ;;  %p535_p8 = scmp.lt.u32.totalorder %s531_s3, %s664_s4 }
 0x2d1   :  { %p537_p9 = pnand %p535_p8, %p532_p7 }
 0x2d3   :  { %540 = shalt.err (!%p537_p9)
}
 0x2d4   :  { %350 = dma.vmem_to_hbm [thread:$0]  %s348_s23, 128, %s664_s4, [#allocation4]  }
 0x2d5   :  { %545 = dma.done.wait [#allocation4], 128  }
 0x2d6   :  { %546 = vsyncadd [#allocation4], 4294967168 }
 0x2d7   :  { %354 = vsyncpa [#allocation3], 1 }
 0x2d8   :  { %355 = vsyncpa [#allocation6], 1 }
 0x2d9   :  { %356 = vsyncpa [#allocation4], 1 }

</bundles_post_ra>
